<compile_context>
chip_gen: v5e
topology: v5e:2x2
jax: 0.10.0
libtpu: 0.0.40
codegen_flags: <defaults>
</compile_context>

<pallas_src>
import jax
import jax.numpy as jnp
import numpy as np
from jax.experimental import pallas as pl
from jax.experimental.pallas import tpu as pltpu


def lstm_pallas(x, layers):
    """x: (S, B, I) float32. layers: dict name -> (weight (out, in), bias (out,))."""
    S, B, I = x.shape
    H = layers["f_h"][0].shape[0]
    BS = B * S
    H2 = 2 * H

    # Fused, pre-transposed weights: output columns = [forget-gate | cell-candidate].
    wx = jnp.concatenate([layers["f_x"][0].T, layers["c_x"][0].T], axis=1)   # (I, 2H)
    bx = jnp.concatenate([layers["f_x"][1], layers["c_x"][1]])[None, :]      # (1, 2H)
    wh = jnp.concatenate([layers["f_h"][0].T, layers["c_h"][0].T], axis=1)   # (H, 2H)
    bh = jnp.concatenate([layers["f_h"][1], layers["c_h"][1]])[None, :]      # (1, 2H)

    # Pack rows in (b, s) order: row b*S + s  <->  (x[s, b], state[s, b]).
    x_bs = jnp.transpose(x, (1, 0, 2)).reshape(BS, I)

    def kernel(x_ref, wx_ref, bx_ref, wh_ref, bh_ref,
               hseq_ref, hfin_ref, cfin_ref,
               fx_sc, cx_sc, h_sc, c_sc):
        i = pl.program_id(0)

        @pl.when(i == 0)
        def _init():
            # Hoisted x projections: one (BS, I) @ (I, 2H) matmul for all steps.
            xproj = jnp.dot(x_ref[...], wx_ref[...],
                            preferred_element_type=jnp.float32) + bx_ref[...]
            fx_sc[...] = xproj[:, :H]          # f_x(x[s, b]) in row b*S + s
            cx_sc[...] = xproj[:, H:]          # c_x(x[s, b]) in row b*S + s
            h_sc[...] = jnp.zeros((BS, H), jnp.float32)
            c_sc[...] = jnp.zeros((BS, H), jnp.float32)

        h_prev = h_sc[...]                     # (BS, H)
        c_prev = c_sc[...]

        # Fused recurrent projection: one (BS,H)@(H,2H) MXU push per step.
        hproj = jnp.dot(h_prev, wh_ref[...],
                        preferred_element_type=jnp.float32) + bh_ref[...]    # (BS, 2H)

        # f_x(x[i, b]) broadcast over the s axis of the state rows: for each batch
        # element b this is row (b*S + i) of fx_sc replicated over S sublanes.
        fx_b = jnp.concatenate(
            [jnp.broadcast_to(fx_sc[pl.ds(b * S + i, 1), :], (S, H))
             for b in range(B)], axis=0)                                      # (BS, H)

        # forget == input == output gate in the reference module.
        gate = jax.nn.sigmoid(fx_b + hproj[:, :H])
        cand = jnp.tanh(cx_sc[...] + hproj[:, H:])
        c_new = gate * (c_prev + cand)
        h_new = gate * jnp.tanh(c_new)

        h_sc[...] = h_new
        c_sc[...] = c_new
        hseq_ref[0] = h_new                    # one dense (BS, H) slab store per step

        @pl.when(i == S - 1)
        def _fin():
            hfin_ref[...] = h_new
            cfin_ref[...] = c_new

    grid_spec = pltpu.PrefetchScalarGridSpec(
        num_scalar_prefetch=0,
        grid=(S,),
        in_specs=[
            pl.BlockSpec((BS, I), lambda i: (0, 0)),
            pl.BlockSpec((I, H2), lambda i: (0, 0)),
            pl.BlockSpec((1, H2), lambda i: (0, 0)),
            pl.BlockSpec((H, H2), lambda i: (0, 0)),
            pl.BlockSpec((1, H2), lambda i: (0, 0)),
        ],
        out_specs=(
            pl.BlockSpec((1, BS, H), lambda i: (i, 0, 0)),   # h_seq: one slab / step
            pl.BlockSpec((BS, H), lambda i: (0, 0)),         # final h (VMEM-resident)
            pl.BlockSpec((BS, H), lambda i: (0, 0)),         # final c (VMEM-resident)
        ),
        scratch_shapes=[
            pltpu.VMEM((BS, H), jnp.float32),   # fx cache
            pltpu.VMEM((BS, H), jnp.float32),   # cx cache
            pltpu.VMEM((BS, H), jnp.float32),   # h state carry
            pltpu.VMEM((BS, H), jnp.float32),   # c state carry
        ],
    )

    out_shape = (
        jax.ShapeDtypeStruct((S, BS, H), jnp.float32),
        jax.ShapeDtypeStruct((BS, H), jnp.float32),
        jax.ShapeDtypeStruct((BS, H), jnp.float32),
    )

    hseq_bs, hfin_bs, cfin_bs = pl.pallas_call(
        kernel,
        grid_spec=grid_spec,
        out_shape=out_shape,
        compiler_params=pltpu.CompilerParams(
            dimension_semantics=("arbitrary",)),   # sequential recurrence
    )(x_bs, wx, bx, wh, bh)

    # Undo the (b, s) row packing (layout plumbing outside the kernel).
    h_seq = hseq_bs.reshape(S, B, S, H).transpose(0, 2, 1, 3)    # (S, S, B, H)
    h_fin = hfin_bs.reshape(B, S, H).transpose(1, 0, 2)          # (S, B, H)
    c_fin = cfin_bs.reshape(B, S, H).transpose(1, 0, 2)          # (S, B, H)
    return h_seq, h_fin, c_fin


def init_params(key, input_size, hidden_size):
    """All eight Linear layers from the module __init__ (PyTorch default init:
    U(-1/sqrt(fan_in), 1/sqrt(fan_in)), weight stored as (out, in))."""
    layers = {}
    for name, fan_in in (("f_x", input_size), ("f_h", hidden_size),
                         ("o_x", input_size), ("o_h", hidden_size),
                         ("i_x", input_size), ("i_h", hidden_size),
                         ("c_x", input_size), ("c_h", hidden_size)):
        key, kw, kb = jax.random.split(key, 3)
        bound = 1.0 / (fan_in ** 0.5)
        w = jax.random.uniform(kw, (hidden_size, fan_in), jnp.float32, -bound, bound)
        b = jax.random.uniform(kb, (hidden_size,), jnp.float32, -bound, bound)
        layers[name] = (w, b)
    return layers


def lstm_ref(x, layers):
    """Pure-JAX transcription of the (buggy) PyTorch forward, for verification."""
    lin = lambda v, wb: v @ wb[0].T + wb[1]
    H = layers["f_h"][0].shape[0]
    h = jnp.zeros((H,), jnp.float32)
    c = jnp.zeros((H,), jnp.float32)
    hs = []
    for i in range(x.shape[0]):
        gate = jax.nn.sigmoid(lin(x[i], layers["f_x"]) + lin(h, layers["f_h"]))
        c = gate * c + gate * jnp.tanh(lin(x, layers["c_x"]) + lin(h, layers["c_h"]))
        h = gate * jnp.tanh(c)
        hs.append(h)
    return jnp.stack(hs), h, c


if __name__ == "__main__":
    S, B, I, H = 8, 2, 4, 32   # seq_len, batch, input_size, hidden_size
    key = jax.random.PRNGKey(0)
    key, kx = jax.random.split(key)
    x = jax.random.normal(kx, (S, B, I), jnp.float32)
    layers = init_params(key, I, H)

    h_seq, h_fin, c_fin = jax.block_until_ready(jax.jit(lstm_pallas)(x, layers))

    r_seq, r_h, r_c = lstm_ref(x, layers)
    assert h_seq.shape == (S, S, B, H)
    assert h_fin.shape == (S, B, H) and c_fin.shape == (S, B, H)
    np.testing.assert_allclose(np.asarray(h_seq), np.asarray(r_seq), rtol=1e-4, atol=1e-4)
    np.testing.assert_allclose(np.asarray(h_fin), np.asarray(r_h), rtol=1e-4, atol=1e-4)
    np.testing.assert_allclose(np.asarray(c_fin), np.asarray(r_c), rtol=1e-4, atol=1e-4)
    print("KERNEL_OK")
</pallas_src>

<mosaic_0001>
module attributes {stable_mosaic.version = 11 : i64} {
  func.func @kernel(%arg0: i32, %arg1: memref<16x4xf32, #tpu.memory_space<vmem>>, %arg2: memref<4x64xf32, #tpu.memory_space<vmem>>, %arg3: memref<1x64xf32, #tpu.memory_space<vmem>>, %arg4: memref<32x64xf32, #tpu.memory_space<vmem>>, %arg5: memref<1x64xf32, #tpu.memory_space<vmem>>, %arg6: memref<1x16x32xf32, #tpu.memory_space<vmem>>, %arg7: memref<16x32xf32, #tpu.memory_space<vmem>>, %arg8: memref<16x32xf32, #tpu.memory_space<vmem>>, %arg9: memref<16x32xf32, #tpu.memory_space<vmem>>, %arg10: memref<16x32xf32, #tpu.memory_space<vmem>>, %arg11: memref<16x32xf32, #tpu.memory_space<vmem>>, %arg12: memref<16x32xf32, #tpu.memory_space<vmem>>) attributes {dimension_semantics = [#tpu.dimension_semantics<arbitrary>], iteration_bounds = array<i64: 8>, scalar_prefetch = 0 : i64, scratch_operands = 4 : i64, tpu.core_type = #tpu.core_type<tc>, window_params = [{pipeline_mode = #tpu.pipeline_mode<synchronous>, transform_indices = @transform_0, window_bounds = array<i64: 16, 4>}, {pipeline_mode = #tpu.pipeline_mode<synchronous>, transform_indices = @transform_1, window_bounds = array<i64: 4, 64>}, {pipeline_mode = #tpu.pipeline_mode<synchronous>, transform_indices = @transform_2, window_bounds = array<i64: 1, 64>}, {pipeline_mode = #tpu.pipeline_mode<synchronous>, transform_indices = @transform_3, window_bounds = array<i64: 32, 64>}, {pipeline_mode = #tpu.pipeline_mode<synchronous>, transform_indices = @transform_4, window_bounds = array<i64: 1, 64>}, {transform_indices = @transform_5, window_bounds = array<i64: 1, 16, 32>}, {pipeline_mode = #tpu.pipeline_mode<synchronous>, transform_indices = @transform_6, window_bounds = array<i64: 16, 32>}, {pipeline_mode = #tpu.pipeline_mode<synchronous>, transform_indices = @transform_7, window_bounds = array<i64: 16, 32>}]} {
    %c0_i32 = arith.constant 0 : i32
    %0 = arith.cmpi eq, %arg0, %c0_i32 : i32
    %1 = arith.extui %0 : i1 to i32
    %c0_i32_0 = arith.constant 0 : i32
    %2 = arith.cmpi ne, %1, %c0_i32_0 : i32
    scf.if %2 {
      %c0_22 = arith.constant 0 : index
      %c0_23 = arith.constant 0 : index
      %44 = vector.load %arg1[%c0_22, %c0_23] : memref<16x4xf32, #tpu.memory_space<vmem>>, vector<16x4xf32>
      %c0_24 = arith.constant 0 : index
      %c0_25 = arith.constant 0 : index
      %45 = vector.load %arg2[%c0_24, %c0_25] : memref<4x64xf32, #tpu.memory_space<vmem>>, vector<4x64xf32>
      %cst_26 = arith.constant dense<0.000000e+00> : vector<16x64xf32>
      %46 = tpu.matmul %44, %45, %cst_26 {dimension_numbers = #tpu.dot_dimension_numbers<[1], [0], [0], [1], [0, 0, 1, 1], [], []>} : vector<16x4xf32>, vector<4x64xf32>, vector<16x64xf32> -> vector<16x64xf32>
      %c0_27 = arith.constant 0 : index
      %c0_28 = arith.constant 0 : index
      %47 = vector.load %arg3[%c0_27, %c0_28] : memref<1x64xf32, #tpu.memory_space<vmem>>, vector<1x64xf32>
      %48 = vector.broadcast %47 : vector<1x64xf32> to vector<16x64xf32>
      %49 = arith.addf %46, %48 : vector<16x64xf32>
      %50 = vector.extract_strided_slice %49 {offsets = [0, 0], sizes = [16, 32], strides = [1, 1]} : vector<16x64xf32> to vector<16x32xf32>
      %c0_29 = arith.constant 0 : index
      %c0_30 = arith.constant 0 : index
      %51 = vector.load %arg9[%c0_29, %c0_30] : memref<16x32xf32, #tpu.memory_space<vmem>>, vector<16x32xf32>
      tpu.vector_store %arg9[%c0_29, %c0_30], %50 {strides = array<i32>} : memref<16x32xf32, #tpu.memory_space<vmem>>, vector<16x32xf32>,
      %52 = vector.extract_strided_slice %49 {offsets = [0, 32], sizes = [16, 32], strides = [1, 1]} : vector<16x64xf32> to vector<16x32xf32>
      %c0_31 = arith.constant 0 : index
      %c0_32 = arith.constant 0 : index
      %53 = vector.load %arg10[%c0_31, %c0_32] : memref<16x32xf32, #tpu.memory_space<vmem>>, vector<16x32xf32>
      tpu.vector_store %arg10[%c0_31, %c0_32], %52 {strides = array<i32>} : memref<16x32xf32, #tpu.memory_space<vmem>>, vector<16x32xf32>,
      %cst_33 = arith.constant 0.000000e+00 : f32
      %54 = vector.broadcast %cst_33 : f32 to vector<16x32xf32>
      %c0_34 = arith.constant 0 : index
      %c0_35 = arith.constant 0 : index
      %55 = vector.load %arg11[%c0_34, %c0_35] : memref<16x32xf32, #tpu.memory_space<vmem>>, vector<16x32xf32>
      tpu.vector_store %arg11[%c0_34, %c0_35], %54 {strides = array<i32>} : memref<16x32xf32, #tpu.memory_space<vmem>>, vector<16x32xf32>,
      %cst_36 = arith.constant 0.000000e+00 : f32
      %56 = vector.broadcast %cst_36 : f32 to vector<16x32xf32>
      %c0_37 = arith.constant 0 : index
      %c0_38 = arith.constant 0 : index
      %57 = vector.load %arg12[%c0_37, %c0_38] : memref<16x32xf32, #tpu.memory_space<vmem>>, vector<16x32xf32>
      tpu.vector_store %arg12[%c0_37, %c0_38], %56 {strides = array<i32>} : memref<16x32xf32, #tpu.memory_space<vmem>>, vector<16x32xf32>,
    } else {
    }
    %c0 = arith.constant 0 : index
    %c0_1 = arith.constant 0 : index
    %3 = vector.load %arg11[%c0, %c0_1] : memref<16x32xf32, #tpu.memory_space<vmem>>, vector<16x32xf32>
    %c0_2 = arith.constant 0 : index
    %c0_3 = arith.constant 0 : index
    %4 = vector.load %arg12[%c0_2, %c0_3] : memref<16x32xf32, #tpu.memory_space<vmem>>, vector<16x32xf32>
    %c0_4 = arith.constant 0 : index
    %c0_5 = arith.constant 0 : index
    %5 = vector.load %arg4[%c0_4, %c0_5] : memref<32x64xf32, #tpu.memory_space<vmem>>, vector<32x64xf32>
    %cst = arith.constant dense<0.000000e+00> : vector<16x64xf32>
    %6 = tpu.matmul %3, %5, %cst {dimension_numbers = #tpu.dot_dimension_numbers<[1], [0], [0], [1], [0, 0, 1, 1], [], []>} : vector<16x32xf32>, vector<32x64xf32>, vector<16x64xf32> -> vector<16x64xf32>
    %c0_6 = arith.constant 0 : index
    %c0_7 = arith.constant 0 : index
    %7 = vector.load %arg5[%c0_6, %c0_7] : memref<1x64xf32, #tpu.memory_space<vmem>>, vector<1x64xf32>
    %8 = vector.broadcast %7 : vector<1x64xf32> to vector<16x64xf32>
    %9 = arith.addf %6, %8 : vector<16x64xf32>
    %c0_i32_8 = arith.constant 0 : i32
    %10 = arith.addi %c0_i32_8, %arg0 : i32
    %11 = arith.index_cast %10 : i32 to index
    %c0_9 = arith.constant 0 : index
    %12 = vector.load %arg9[%11, %c0_9] : memref<16x32xf32, #tpu.memory_space<vmem>>, vector<1x32xf32>
    %13 = vector.shape_cast %12 : vector<1x32xf32> to vector<1x32xf32>
    %14 = vector.broadcast %13 : vector<1x32xf32> to vector<8x32xf32>
    %c8_i32 = arith.constant 8 : i32
    %15 = arith.addi %c8_i32, %arg0 : i32
    %16 = arith.index_cast %15 : i32 to index
    %c0_10 = arith.constant 0 : index
    %17 = vector.load %arg9[%16, %c0_10] : memref<16x32xf32, #tpu.memory_space<vmem>>, vector<1x32xf32>
    %18 = vector.shape_cast %17 : vector<1x32xf32> to vector<1x32xf32>
    %19 = vector.broadcast %18 : vector<1x32xf32> to vector<8x32xf32>
    %20 = tpu.concatenate %14, %19 in 0 : vector<8x32xf32>, vector<8x32xf32> -> vector<16x32xf32>
    %21 = vector.extract_strided_slice %9 {offsets = [0, 0], sizes = [16, 32], strides = [1, 1]} : vector<16x64xf32> to vector<16x32xf32>
    %22 = arith.addf %20, %21 : vector<16x32xf32>
    %23 = arith.negf %22 : vector<16x32xf32>
    %24 = math.exp %23 : vector<16x32xf32>
    %cst_11 = arith.constant 1.000000e+00 : f32
    %25 = vector.broadcast %cst_11 : f32 to vector<16x32xf32>
    %26 = arith.addf %25, %24 : vector<16x32xf32>
    %27 = arith.divf %25, %26 : vector<16x32xf32>
    %c0_12 = arith.constant 0 : index
    %c0_13 = arith.constant 0 : index
    %28 = vector.load %arg10[%c0_12, %c0_13] : memref<16x32xf32, #tpu.memory_space<vmem>>, vector<16x32xf32>
    %29 = vector.extract_strided_slice %9 {offsets = [0, 32], sizes = [16, 32], strides = [1, 1]} : vector<16x64xf32> to vector<16x32xf32>
    %30 = arith.addf %28, %29 : vector<16x32xf32>
    %31 = math.tanh %30 : vector<16x32xf32>
    %32 = arith.addf %4, %31 : vector<16x32xf32>
    %33 = arith.mulf %27, %32 : vector<16x32xf32>
    %34 = math.tanh %33 : vector<16x32xf32>
    %35 = arith.mulf %27, %34 : vector<16x32xf32>
    %c0_14 = arith.constant 0 : index
    %c0_15 = arith.constant 0 : index
    %36 = vector.load %arg11[%c0_14, %c0_15] : memref<16x32xf32, #tpu.memory_space<vmem>>, vector<16x32xf32>
    tpu.vector_store %arg11[%c0_14, %c0_15], %35 {strides = array<i32>} : memref<16x32xf32, #tpu.memory_space<vmem>>, vector<16x32xf32>,
    %c0_16 = arith.constant 0 : index
    %c0_17 = arith.constant 0 : index
    %37 = vector.load %arg12[%c0_16, %c0_17] : memref<16x32xf32, #tpu.memory_space<vmem>>, vector<16x32xf32>
    tpu.vector_store %arg12[%c0_16, %c0_17], %33 {strides = array<i32>} : memref<16x32xf32, #tpu.memory_space<vmem>>, vector<16x32xf32>,
    %c0_18 = arith.constant 0 : index
    %c0_19 = arith.constant 0 : index
    %c0_20 = arith.constant 0 : index
    %38 = vector.load %arg6[%c0_18, %c0_19, %c0_20] : memref<1x16x32xf32, #tpu.memory_space<vmem>>, vector<1x16x32xf32>
    %39 = vector.shape_cast %38 : vector<1x16x32xf32> to vector<16x32xf32>
    %40 = vector.shape_cast %35 : vector<16x32xf32> to vector<1x16x32xf32>
    tpu.vector_store %arg6[%c0_18, %c0_19, %c0_20], %40 {strides = array<i32>} : memref<1x16x32xf32, #tpu.memory_space<vmem>>, vector<1x16x32xf32>,
    %c7_i32 = arith.constant 7 : i32
    %41 = arith.cmpi eq, %arg0, %c7_i32 : i32
    %42 = arith.extui %41 : i1 to i32
    %c0_i32_21 = arith.constant 0 : i32
    %43 = arith.cmpi ne, %42, %c0_i32_21 : i32
    scf.if %43 {
      %c0_22 = arith.constant 0 : index
      %c0_23 = arith.constant 0 : index
      %44 = vector.load %arg7[%c0_22, %c0_23] : memref<16x32xf32, #tpu.memory_space<vmem>>, vector<16x32xf32>
      tpu.vector_store %arg7[%c0_22, %c0_23], %35 {strides = array<i32>} : memref<16x32xf32, #tpu.memory_space<vmem>>, vector<16x32xf32>,
      %c0_24 = arith.constant 0 : index
      %c0_25 = arith.constant 0 : index
      %45 = vector.load %arg8[%c0_24, %c0_25] : memref<16x32xf32, #tpu.memory_space<vmem>>, vector<16x32xf32>
      tpu.vector_store %arg8[%c0_24, %c0_25], %33 {strides = array<i32>} : memref<16x32xf32, #tpu.memory_space<vmem>>, vector<16x32xf32>,
    } else {
    }
    return
  }
  func.func @transform_0(%arg0: i32) -> (i32, i32) {
    %c0_i32 = arith.constant 0 : i32
    %c0_i32_0 = arith.constant 0 : i32
    %c0_i32_1 = arith.constant 0 : i32
    return %c0_i32, %c0_i32_0 : i32, i32
  }
  func.func @transform_1(%arg0: i32) -> (i32, i32) {
    %c0_i32 = arith.constant 0 : i32
    %c0_i32_0 = arith.constant 0 : i32
    %c0_i32_1 = arith.constant 0 : i32
    return %c0_i32, %c0_i32_0 : i32, i32
  }
  func.func @transform_2(%arg0: i32) -> (i32, i32) {
    %c0_i32 = arith.constant 0 : i32
    %c0_i32_0 = arith.constant 0 : i32
    %c0_i32_1 = arith.constant 0 : i32
    return %c0_i32, %c0_i32_0 : i32, i32
  }
  func.func @transform_3(%arg0: i32) -> (i32, i32) {
    %c0_i32 = arith.constant 0 : i32
    %c0_i32_0 = arith.constant 0 : i32
    %c0_i32_1 = arith.constant 0 : i32
    return %c0_i32, %c0_i32_0 : i32, i32
  }
  func.func @transform_4(%arg0: i32) -> (i32, i32) {
    %c0_i32 = arith.constant 0 : i32
    %c0_i32_0 = arith.constant 0 : i32
    %c0_i32_1 = arith.constant 0 : i32
    return %c0_i32, %c0_i32_0 : i32, i32
  }
  func.func @transform_5(%arg0: i32) -> (i32, i32, i32) {
    %c0_i32 = arith.constant 0 : i32
    %c0_i32_0 = arith.constant 0 : i32
    %c0_i32_1 = arith.constant 0 : i32
    return %arg0, %c0_i32, %c0_i32_0 : i32, i32, i32
  }
  func.func @transform_6(%arg0: i32) -> (i32, i32) {
    %c0_i32 = arith.constant 0 : i32
    %c0_i32_0 = arith.constant 0 : i32
    %c0_i32_1 = arith.constant 0 : i32
    return %c0_i32, %c0_i32_0 : i32, i32
  }
  func.func @transform_7(%arg0: i32) -> (i32, i32) {
    %c0_i32 = arith.constant 0 : i32
    %c0_i32_0 = arith.constant 0 : i32
    %c0_i32_1 = arith.constant 0 : i32
    return %c0_i32, %c0_i32_0 : i32, i32
  }
}

</mosaic_0001>

<bundles_post_ra>
// kernel: lstm_pallas.1
= control target key start
LH: loop header
LB: loop body
LE: loop exit
PB: predicated region body
PF: predicated region fallthrough
CT: control target
= control target key end

     0   :  { %s614_s24 = smov 0   ;;  %s698_s0 = inlined_call_operand.vmem [shape: f32[16,4], index: 0, kind: input, shape index: {}]   ;;  %s699_s1 = inlined_call_operand.vmem [shape: f32[4,64], index: 1, kind: input, shape index: {}]   ;;  %s700_s2 = inlined_call_operand.vmem [shape: f32[1,64], index: 2, kind: input, shape index: {}]   ;;  %s701_s3 = inlined_call_operand.vmem [shape: f32[32,64], index: 3, kind: input, shape index: {}]   ;;  %s702_s4 = inlined_call_operand.vmem [shape: f32[1,64], index: 4, kind: input, shape index: {}]   ;;  %s703_s5 = inlined_call_operand.vmem [shape: f32[8,16,32], index: 5, kind: output, shape index: {0}]   ;;  %s704_s6 = inlined_call_operand.vmem [shape: f32[16,32], index: 6, kind: output, shape index: {1}]   ;;  %s705_s7 = inlined_call_operand.vmem [shape: f32[16,32], index: 7, kind: output, shape index: {2}]  }
   0x1 LB: > { %s620_s25 = sadd.s32 4294967295, %s569_s24   ;;  %p502_p0 = scmp.ge.s32.totalorder %s569_s24, 1  ;;  %s569_s24 = sphi %s614_s24, %s18_s24  }
   0x2   : > { %p222_p1 = scmp.lt.s32.totalorder %s569_s24, 9 }
   0x4   : > { %p223_p2 = pnand %p502_p0, %p222_p1 }
   0x5   : > { %p249_p3 = scmp.lt.s32.totalorder (!%p223_p2), %s620_s25, 7  ;;  %p505_p4 = scmp.ne.s32.totalorder (!%p223_p2), %s620_s25, 0 }
   0x6   : > { %226 = sbr.rel (%p223_p2) target bundleno = 558 (0x22e), region = 40 }
   0xb   : > { %s250_s26 = scalar_select %p249_p3, %s620_s25, 7 }
   0xc   : > { %257 = sbr.rel (%p505_p4) target bundleno = 271 (0x10f), region = 44  ;;  %s572_s16 = smov (!%p505_p4), 96  }
   0xd   : > { %s519_s27 = sshll.u32 %s250_s26, 4 }
   0xe   : > { %s629_s30 = scalar_lea.vmem %s703_s5, %s519_s27 }
  0x11   : > { %v260_v0 = vld [vmem:[%s699_s1] sm:$0xf]  ;;  %vm272_vm0 = vcmask 1043456   ;;  %vm265_vm1 = vcmask 31744   ;;  %v259_v2 = vld [vmem:[%s698_s0 + $0x8] sm:$0xff]  ;;  %vm299_vm2 = vcmask 261120  }
  0x12   : > { %v258_v1 = vld [vmem:[%s698_s0] sm:$0xff]  ;;  %506 = vmatpush.msk.msra.mxu0 %vm272_vm0, %v260_v0  ;;  %527 = vmatpush.msk.msra.mxu1 %vm272_vm0, %v260_v0  ;;  %v571_v3 = vmov 0.0  }
  0x13   : > { %507 = vmatmul.msk.f32.vlgmr.msra.gmra.mxu0 %vm265_vm1, %v258_v1  ;;  %508 = vmatmul.msk.f32.vlgmr.msra.gmra.mxu1 %vm265_vm1, %v259_v2  ;;  %312 = vst.msk [vmem:[#allocation4] sm:$0xff] %vm299_vm2, %v571_v3  ;;  %v543_v4 = vld [vmem:[%s700_s2] ss:$0 sm:$0xff] }
  0x14   : > { %313 = vst.msk [vmem:[#allocation4 + $0x8] sm:$0xff] %vm299_vm2, %v571_v3 }
  0x15   : > { %314 = vst.msk [vmem:[#allocation5] sm:$0xff] %vm299_vm2, %v571_v3 }
  0x16   : > { %315 = vst.msk [vmem:[#allocation5 + $0x8] sm:$0xff] %vm299_vm2, %v571_v3 }
  0x90   : > { %v293_v5 = vpop.f32.mrf.mxu0  ;;  %v296_v6 = vpop.f32.mrf.mxu1 }
  0x91   : > { %v294_v7 = vadd.f32 %v543_v4, %v293_v5  ;;  %v297_v8 = vadd.f32 %v543_v4, %v296_v6 }
  0x93   : > { %300 = vst.msk [vmem:[#allocation2] sm:$0xff] %vm299_vm2, %v294_v7  ;;  %304 = vrot.lane.b32.xlu0 %v294_v7, %s572_s16 }
  0x94   : > { %301 = vst.msk [vmem:[#allocation2 + $0x8] sm:$0xff] %vm299_vm2, %v297_v8 }
  0x9b   : > { %306 = vrot.lane.b32.xlu0 %v297_v8, %s572_s16 }
 0x105   : > { %v305_v9 = vpop.permute.xlu0 %304 }
 0x106   : > { %310 = vst.msk [vmem:[#allocation3] sm:$0xff] %vm299_vm2, %v305_v9 }
 0x10d   : > { %v307_v10 = vpop.permute.xlu0 %306 }
 0x10e   : > { %311 = vst.msk [vmem:[#allocation3 + $0x8] sm:$0xff] %vm299_vm2, %v307_v10 }
 0x10f PF: > { %v323_v11 = vld [vmem:[%s701_s3 + $0x18] sm:$0xff]  ;;  %v322_v12 = vld [vmem:[%s701_s3 + $0x10] sm:$0xff]  ;;  %v321_v13 = vld [vmem:[%s701_s3 + $0x8] sm:$0xff]  ;;  %vm328_vm3 = vcmask 261120   ;;  %s520_s27 = scalar_lea.vmem [#allocation2], %s569_s24  ;;  %s573_s8 = smov 96  }
 0x110   : > { %347 = vmatpush.msra.mxu0 %v323_v11  ;;  %528 = vmatpush.msra.mxu1 %v323_v11  ;;  %v320_v14 = vld [vmem:[%s701_s3] sm:$0xff]  ;;  %v317_v16 = vld [vmem:[#allocation4 + $0x8] sm:$0xff]  ;;  %v545_v22 = vld [vmem:[%s520_s27 - $0x1] ss:$0 sm:$0xff]  ;;  %p516_p5 = scmp.ne.s32.totalorder %s620_s25, 7 }
 0x111   : > { %v316_v15 = vld [vmem:[#allocation4] sm:$0xff]  ;;  %v405_v36 = vld [vmem:[#allocation3] sm:$0xff]  ;;  %v319_v59 = vld [vmem:[#allocation5 + $0x8] sm:$0xff] }
 0x112   : > { %348 = vmatpush.msra.mxu0 %v322_v12  ;;  %529 = vmatpush.msra.mxu1 %v322_v12  ;;  %v544_v17 = vld [vmem:[%s702_s4] ss:$0 sm:$0xff]  ;;  %v546_v25 = vld [vmem:[%s520_s27 + $0x7] ss:$0 sm:$0xff]  ;;  %v318_v46 = vld [vmem:[#allocation5] sm:$0xff] }
 0x114   : > { %349 = vmatpush.msra.mxu0 %v321_v13  ;;  %530 = vmatpush.msra.mxu1 %v321_v13 }
 0x115   : > { %v406_v45 = vld [vmem:[#allocation3 + $0x8] sm:$0xff] }
 0x116   : > { %350 = vmatpush.msra.mxu0 %v320_v14  ;;  %531 = vmatpush.msra.mxu1 %v320_v14 }
 0x117   : > { %509 = vmatmul.msk.f32.vlgmr.msra.gmra.mxu0 %vm328_vm3, %v316_v15  ;;  %510 = vmatmul.msk.f32.vlgmr.msra.gmra.mxu1 %vm328_vm3, %v317_v16 }
 0x194   : > { %v352_v18 = vpop.f32.mrf.mxu0  ;;  %v355_v20 = vpop.f32.mrf.mxu1 }
 0x195   : > { %v353_v19 = vadd.f32 %v544_v17, %v352_v18  ;;  %v356_v21 = vadd.f32 %v544_v17, %v355_v20 }
 0x197   : > { %409 = vrot.lane.b32.xlu0 %v353_v19, %s573_s8  ;;  %v365_v23 = vadd.f32 %v545_v22, %v353_v19  ;;  %v366_v26 = vadd.f32 %v546_v25, %v356_v21 }
 0x199   : > { %v514_v24 = vmul.f32 -1.442695, %v365_v23  ;;  %v515_v27 = vmul.f32 -1.442695, %v366_v26 }
 0x19b   : > { %547 = vpow2.f32 %v514_v24 }
 0x19c   : > { %549 = vpow2.f32 %v515_v27 }
 0x19f   : > { %411 = vrot.lane.b32.xlu0 %v356_v21, %s573_s8 }
 0x1a1   : > { %v548_v28 = vpop.eup %547 }
 0x1a2   : > { %v373_v29 = vadd.f32 1.0, %v548_v28  ;;  %v550_v30 = vpop.eup %549 }
 0x1a3   : > { %v374_v31 = vadd.f32 1.0, %v550_v30 }
 0x1a4   : > { %551 = vrcp.f32 %v373_v29  ;;  %v386_v43 = vand.u32 2147483648, %v373_v29  ;;  %vm380_vm5 = vweird.f32 %v373_v29  ;;  %v384_v44 = vand.u32 2147483647, %v373_v29 }
 0x1a5   : > { %553 = vrcp.f32 %v374_v31  ;;  %vm395_vm8 = vweird.f32 %v374_v31  ;;  %v401_v57 = vand.u32 2147483648, %v374_v31  ;;  %v399_v58 = vand.u32 2147483647, %v374_v31 }
 0x1a6   : > { %v387_v51 = vor.u32 1.1754944e-38, %v386_v43  ;;  %vm385_vm7 = vcmp.eq.f32.partialorder %v384_v44, 8.507059e+37 }
 0x1a7   : > { %v402_v62 = vor.u32 1.1754944e-38, %v401_v57  ;;  %vm400_vm11 = vcmp.eq.f32.partialorder %v399_v58, 8.507059e+37 }
 0x1aa   : > { %v552_v32 = vpop.eup %551 }
 0x1ab   : > { %v376_v33 = vmul.f32 %v552_v32, %v373_v29  ;;  %v554_v35 = vpop.eup %553  ;;  %vm381_vm4 = vweird.f32 %v552_v32 }
 0x1ac   : > { %v391_v37 = vmul.f32 %v554_v35, %v374_v31  ;;  %vm382_vm6 = vmor %vm380_vm5, %vm381_vm4  ;;  %vm396_vm9 = vweird.f32 %v554_v35 }
 0x1ad   : > { %v377_v34 = vsub.f32 1.0, %v376_v33  ;;  %vm397_vm10 = vmor %vm395_vm8, %vm396_vm9 }
 0x1ae   : > { %v392_v41 = vsub.f32 1.0, %v391_v37 }
 0x1af   : > { %v378_v39 = vmul.f32 %v552_v32, %v377_v34 }
 0x1b0   : > { %v393_v48 = vmul.f32 %v554_v35, %v392_v41 }
 0x1b1   : > { %v379_v42 = vadd.f32 %v552_v32, %v378_v39 }
 0x1b2   : > { %v394_v56 = vadd.f32 %v554_v35, %v393_v48 }
 0x1b3   : > { %v383_v47 = vsel %vm382_vm6, %v552_v32, %v379_v42 }
 0x1b4   : > { %v388_v54 = vsel %vm385_vm7, %v387_v51, %v383_v47  ;;  %v398_v60 = vsel %vm397_vm10, %v554_v35, %v394_v56 }
 0x1b5   : > { %v403_v0 = vsel %vm400_vm11, %v402_v62, %v398_v60 }
 0x209   : > { %v410_v38 = vpop.permute.xlu0 %409 }
 0x20a   : > { %v415_v40 = vadd.f32 %v410_v38, %v405_v36 }
 0x20c   : > { %555 = vtanh.f32 %v415_v40 }
 0x211   : > { %v412_v49 = vpop.permute.xlu0 %411 }
 0x212   : > { %v556_v50 = vpop.eup %555  ;;  %v416_v52 = vadd.f32 %v412_v49, %v406_v45 }
 0x213   : > { %v419_v53 = vadd.f32 %v556_v50, %v318_v46 }
 0x214   : > { %557 = vtanh.f32 %v416_v52 }
 0x215   : > { %v421_v55 = vmul.f32 %v419_v53, %v388_v54 }
 0x217   : > { %559 = vtanh.f32 %v421_v55  ;;  %429 = vst.msk [vmem:[#allocation5] sm:$0xff] %vm328_vm3, %v421_v55 }
 0x21a   : > { %v558_v61 = vpop.eup %557 }
 0x21b   : > { %v420_v63 = vadd.f32 %v558_v61, %v319_v59 }
 0x21d   : > { %v560_v1 = vpop.eup %559  ;;  %v422_v2 = vmul.f32 %v420_v63, %v403_v0 }
 0x21e   : > { %v425_v3 = vmul.f32 %v560_v1, %v388_v54 }
 0x21f   : > { %561 = vtanh.f32 %v422_v2  ;;  %430 = vst.msk [vmem:[#allocation5 + $0x8] sm:$0xff] %vm328_vm3, %v422_v2 }
 0x220   : > { %427 = vst.msk [vmem:[#allocation4] sm:$0xff] %vm328_vm3, %v425_v3 }
 0x221   : > { %431 = vst.msk [vmem:[%s629_s30] sm:$0xff] %vm328_vm3, %v425_v3 }
 0x225   : > { %v562_v4 = vpop.eup %561  ;;  %436 = sbr.rel (%p516_p5) target bundleno = 558 (0x22e), region = 48 }
 0x226   : > { %v426_v5 = vmul.f32 %v562_v4, %v403_v0 }
 0x228   : > { %428 = vst.msk [vmem:[#allocation4 + $0x8] sm:$0xff] %vm328_vm3, %v426_v5 }
 0x229   : > { %432 = vst.msk [vmem:[%s629_s30 + $0x8] sm:$0xff] %vm328_vm3, %v426_v5 }
 0x22a   : > { %437 = vst.msk [vmem:[%s704_s6] sm:$0xff] %vm328_vm3, %v425_v3 }
 0x22b   : > { %438 = vst.msk [vmem:[%s704_s6 + $0x8] sm:$0xff] %vm328_vm3, %v426_v5 }
 0x22c   : > { %439 = vst.msk [vmem:[%s705_s7] sm:$0xff] %vm328_vm3, %v421_v55 }
 0x22d   : > { %440 = vst.msk [vmem:[%s705_s7 + $0x8] sm:$0xff] %vm328_vm3, %v422_v2 }
 0x22e PF: > { %s18_s24 = sadd.s32 1, %s569_s24  }
 0x22f   : > { %p15_p6 = scmp.ge.s32.totalorder %s18_s24, 10  }
 0x231   :  { %17 = sbr.rel (!%p15_p6) target bundleno = 1 (0x1), region = 93 }

</bundles_post_ra>
